<compile_context>
chip_gen: v7x
topology: tpu7x:2x2x1
jax: 0.10.0
libtpu: 0.0.40
codegen_flags: <defaults>
</compile_context>

<pallas_src>
import functools

import jax
import jax.numpy as jnp
from jax.experimental import pallas as pl
from jax.experimental.pallas import tpu as pltpu


def _round_up(x, m):
    return ((x + m - 1) // m) * m


def _vmem_capacity_bytes():
    """Per-core VMEM capacity; conservative fallback if the query is unavailable."""
    try:
        info = pltpu.get_tpu_info()
        cap = getattr(info, "vmem_capacity_bytes", None)
        if cap:
            return int(cap)
    except Exception:
        pass
    return 64 * 1024 * 1024  # v7x per-TensorCore VMEM (safe lower bound)


def _xent_kernel(logits_ref, targets_ref, out_ref, acc_ref, *, pad_index, n_rows):
    """One (b, p, t) grid step.

    logits_ref : (1, TM, V)   native-dtype logits tile
    targets_ref: (1, TM, 1)   int32 targets tile
    out_ref    : (1, 1, 1)    f32 partial sum for this (b, p) slice
    acc_ref    : (TM, 1)      f32 per-row accumulator (persists across t)
    """
    p = pl.program_id(1)
    t = pl.program_id(2)
    n_t = pl.num_programs(2)

    @pl.when(t == 0)
    def _():
        acc_ref[...] = jnp.zeros_like(acc_ref)

    logits = logits_ref[0].astype(jnp.float32)   # (TM, V)
    tgt = targets_ref[0]                         # (TM, 1) int32
    tm, v = logits.shape

    # Numerically stable logsumexp over the vocab (lane) axis.
    m = jnp.max(logits, axis=-1, keepdims=True)
    lse = m + jnp.log(jnp.sum(jnp.exp(logits - m), axis=-1, keepdims=True))

    # Target logit via select + lane reduce (no float one-hot materialization).
    vocab_ids = jax.lax.broadcasted_iota(jnp.int32, (tm, v), 1)
    tgt_logit = jnp.sum(jnp.where(vocab_ids == tgt, logits, 0.0),
                        axis=-1, keepdims=True)

    # Row validity: in-range rows (handles ragged/clamped tiles without any
    # wrapper padding) AND target != pad_index (ignore_index semantics).
    row_ids = (p * n_t + t) * tm + jax.lax.broadcasted_iota(jnp.int32, (tm, 1), 0)
    valid = jnp.logical_and(row_ids < n_rows, tgt != pad_index)

    acc_ref[...] += jnp.where(valid, lse - tgt_logit, 0.0)

    @pl.when(t == n_t - 1)
    def _():
        out_ref[0] = jnp.sum(acc_ref[...], axis=0, keepdims=True)


def _xent_partial_sums(logits, targets, pad_index):
    """logits: (B', S', V) float; targets: (B', S') int.
    Returns (B',) summed cross entropy per leading index (ignoring pad_index)."""
    bp, sp, v = logits.shape
    targets3 = targets.reshape(bp, sp, 1).astype(jnp.int32)

    itemsize = jnp.dtype(logits.dtype).itemsize
    g = max(8, 32 // max(1, itemsize))           # sublane granularity for dtype
    v_lanes = _round_up(v, 128)                  # physical lane footprint
    bytes_per_row = v_lanes * itemsize

    # Generation-aware tile sizing: double-buffered logits stream <= ~60% VMEM.
    capacity = _vmem_capacity_bytes()
    budget = int(capacity * 0.60)
    tm = budget // (2 * bytes_per_row)
    tm = min(tm, 2048, _round_up(sp, g))
    tm = max(g, (tm // g) * g)

    total_tiles = pl.cdiv(sp, tm)
    n_par = 2 if total_tiles >= 2 else 1         # megacore split of the reduction
    t_per = pl.cdiv(total_tiles, n_par)
    last_tile = total_tiles - 1

    vmem_needed = (2 * tm * bytes_per_row               # logits double buffer
                   + 2 * _round_up(tm, 8) * 128 * 4     # targets double buffer
                   + _round_up(tm, 8) * 128 * 4)        # accumulator scratch
    vmem_limit = int(min(0.9 * capacity,
                         max(32 * 1024 * 1024, vmem_needed + (16 << 20))))

    cost = pl.CostEstimate(
        flops=int(6 * bp * sp * v),
        transcendentals=int(bp * sp * v),
        bytes_accessed=int(bp * sp * v * itemsize + bp * sp * 4 + bp * n_par * 4),
    )

    kernel = functools.partial(_xent_kernel, pad_index=pad_index, n_rows=sp)

    out = pl.pallas_call(
        kernel,
        out_shape=jax.ShapeDtypeStruct((bp * n_par, 1, 1), jnp.float32),
        grid_spec=pltpu.PrefetchScalarGridSpec(
            num_scalar_prefetch=0,
            grid=(bp, n_par, t_per),
            in_specs=[
                pl.BlockSpec(
                    (1, tm, v),
                    lambda b, p, t: (b, jnp.minimum(p * t_per + t, last_tile), 0)),
                pl.BlockSpec(
                    (1, tm, 1),
                    lambda b, p, t: (b, jnp.minimum(p * t_per + t, last_tile), 0)),
            ],
            out_specs=pl.BlockSpec((1, 1, 1),
                                   lambda b, p, t: (b * n_par + p, 0, 0)),
            scratch_shapes=[pltpu.VMEM((tm, 1), jnp.float32)],
        ),
        compiler_params=pltpu.CompilerParams(
            dimension_semantics=("parallel", "parallel", "arbitrary"),
            vmem_limit_bytes=vmem_limit,
        ),
        cost_estimate=cost,
    )(logits, targets3)

    return jnp.sum(out.reshape(bp, n_par), axis=-1)   # (B',)


def token_cross_entropy_loss(outputs, targets, pad_index=0, keep_batch=False):
    """JAX/Pallas equivalent of TokenCrossEntropyLoss.forward.

    outputs: (B, S, V) float logits, targets: (B, S) int targets.
    Returns scalar sum loss (keep_batch=False) or per-batch sums of shape (B,).
    """
    b, s, v = outputs.shape
    if keep_batch:
        return _xent_partial_sums(outputs, targets, pad_index)            # (B,)
    flat = _xent_partial_sums(outputs.reshape(1, b * s, v),
                              targets.reshape(1, b * s), pad_index)       # (1,)
    return flat[0]


def _reference_per_position(outputs, targets, pad_index=0):
    logits = outputs.astype(jnp.float32)
    lse = jax.scipy.special.logsumexp(logits, axis=-1)
    tgt_logit = jnp.take_along_axis(
        logits, targets[..., None].astype(jnp.int32), axis=-1)[..., 0]
    mask = (targets != pad_index).astype(jnp.float32)
    return (lse - tgt_logit) * mask   # (B, S)


if __name__ == "__main__":
    key = jax.random.PRNGKey(0)
    B, S, V = 2, 8, 128
    k1, k2, k3, k4 = jax.random.split(key, 4)
    outputs = jax.random.normal(k1, (B, S, V), dtype=jnp.float32)
    targets = jax.random.randint(k2, (B, S), 0, V, dtype=jnp.int32)
    targets = targets.at[0, :2].set(0)   # pad tokens exercise ignore_index

    per_pos = _reference_per_position(outputs, targets, 0)

    loss = jax.block_until_ready(
        token_cross_entropy_loss(outputs, targets, pad_index=0))
    ref = jnp.sum(per_pos)
    assert jnp.allclose(loss, ref, rtol=1e-5, atol=1e-4), (loss, ref)

    loss_b = jax.block_until_ready(
        token_cross_entropy_loss(outputs, targets, pad_index=0, keep_batch=True))
    ref_b = jnp.sum(per_pos, axis=-1)
    assert jnp.allclose(loss_b, ref_b, rtol=1e-5, atol=1e-4), (loss_b, ref_b)

    # Ragged shapes + bf16: exercises native-dtype streaming and the in-kernel
    # row / vocab masking (no wrapper-side padding anywhere).
    B2, S2, V2 = 2, 7, 100
    outputs2 = jax.random.normal(k3, (B2, S2, V2), dtype=jnp.bfloat16)
    targets2 = jax.random.randint(k4, (B2, S2), 0, V2, dtype=jnp.int32)
    targets2 = targets2.at[1, :3].set(0)
    per_pos2 = _reference_per_position(outputs2, targets2, 0)

    loss2 = jax.block_until_ready(
        token_cross_entropy_loss(outputs2, targets2, pad_index=0))
    ref2 = jnp.sum(per_pos2)
    assert jnp.allclose(loss2, ref2, rtol=1e-4, atol=1e-2), (loss2, ref2)

    print("KERNEL_OK")
</pallas_src>

<mosaic_0001>
module attributes {stable_mosaic.version = 11 : i64} {
  func.func @_xent_kernel(%arg0: i32, %arg1: i32, %arg2: i32, %arg3: memref<1x16x128xf32, #tpu.memory_space<vmem>>, %arg4: memref<1x16x1xi32, #tpu.memory_space<vmem>>, %arg5: memref<1x1x1xf32, #tpu.memory_space<vmem>>, %arg6: memref<16x1xf32, #tpu.memory_space<vmem>>) attributes {dimension_semantics = [#tpu.dimension_semantics<parallel>, #tpu.dimension_semantics<parallel>, #tpu.dimension_semantics<arbitrary>], iteration_bounds = array<i64: 1, 1, 1>, scalar_prefetch = 0 : i64, scratch_operands = 1 : i64, tpu.core_type = #tpu.core_type<tc>, window_params = [{transform_indices = @transform_0, window_bounds = array<i64: 1, 16, 128>}, {transform_indices = @transform_1, window_bounds = array<i64: 1, 16, 1>}, {transform_indices = @transform_2, window_bounds = array<i64: 1, 1, 1>}]} {
    %c0_i32 = arith.constant 0 : i32
    %0 = arith.cmpi eq, %arg2, %c0_i32 : i32
    %1 = arith.extui %0 : i1 to i32
    %c0_i32_0 = arith.constant 0 : i32
    %2 = arith.cmpi ne, %1, %c0_i32_0 : i32
    scf.if %2 {
      %cst_18 = arith.constant 0.000000e+00 : f32
      %43 = vector.broadcast %cst_18 : f32 to vector<16x1xf32>
      %c0_19 = arith.constant 0 : index
      %c0_20 = arith.constant 0 : index
      %44 = vector.load %arg6[%c0_19, %c0_20] : memref<16x1xf32, #tpu.memory_space<vmem>>, vector<16x1xf32>
      tpu.vector_store %arg6[%c0_19, %c0_20], %43 {strides = array<i32>} : memref<16x1xf32, #tpu.memory_space<vmem>>, vector<16x1xf32>,
    } else {
    }
    %c0 = arith.constant 0 : index
    %c0_1 = arith.constant 0 : index
    %c0_2 = arith.constant 0 : index
    %3 = vector.load %arg3[%c0, %c0_1, %c0_2] : memref<1x16x128xf32, #tpu.memory_space<vmem>>, vector<1x16x128xf32>
    %4 = vector.shape_cast %3 : vector<1x16x128xf32> to vector<16x128xf32>
    %c0_3 = arith.constant 0 : index
    %c0_4 = arith.constant 0 : index
    %c0_5 = arith.constant 0 : index
    %5 = vector.load %arg4[%c0_3, %c0_4, %c0_5] : memref<1x16x1xi32, #tpu.memory_space<vmem>>, vector<1x16x1xi32>
    %6 = vector.shape_cast %5 : vector<1x16x1xi32> to vector<16x1xi32>
    %cst = arith.constant dense<0xFF800000> : vector<16xf32>
    %7 = vector.multi_reduction <maximumf>, %4, %cst [1] : vector<16x128xf32> to vector<16xf32>
    %8 = vector.shape_cast %7 : vector<16xf32> to vector<16x1xf32>
    %9 = vector.broadcast %8 : vector<16x1xf32> to vector<16x128xf32>
    %10 = arith.subf %4, %9 : vector<16x128xf32>
    %11 = math.exp %10 : vector<16x128xf32>
    %cst_6 = arith.constant dense<0.000000e+00> : vector<16xf32>
    %12 = vector.multi_reduction <add>, %11, %cst_6 [1] : vector<16x128xf32> to vector<16xf32>
    %13 = vector.shape_cast %12 : vector<16xf32> to vector<16x1xf32>
    %14 = math.log %13 : vector<16x1xf32>
    %15 = arith.addf %8, %14 : vector<16x1xf32>
    %16 = tpu.iota {dimensions = array<i32: 1>} : vector<16x128xi32>
    %17 = vector.broadcast %6 : vector<16x1xi32> to vector<16x128xi32>
    %18 = arith.cmpi eq, %16, %17 : vector<16x128xi32>
    %cst_7 = arith.constant 0.000000e+00 : f32
    %19 = vector.broadcast %cst_7 : f32 to vector<16x128xf32>
    %20 = arith.select %18, %4, %19 : vector<16x128xi1>, vector<16x128xf32>
    %cst_8 = arith.constant dense<0.000000e+00> : vector<16xf32>
    %21 = vector.multi_reduction <add>, %20, %cst_8 [1] : vector<16x128xf32> to vector<16xf32>
    %22 = vector.shape_cast %21 : vector<16xf32> to vector<16x1xf32>
    %c1_i32 = arith.constant 1 : i32
    %23 = arith.muli %arg1, %c1_i32 : i32
    %24 = arith.addi %23, %arg2 : i32
    %c16_i32 = arith.constant 16 : i32
    %25 = arith.muli %24, %c16_i32 : i32
    %26 = tpu.iota {dimensions = array<i32: 0>} : vector<16x1xi32>
    %27 = vector.broadcast %25 : i32 to vector<16x1xi32>
    %28 = arith.addi %27, %26 : vector<16x1xi32>
    %c16_i32_9 = arith.constant 16 : i32
    %29 = vector.broadcast %c16_i32_9 : i32 to vector<16x1xi32>
    %30 = arith.cmpi slt, %28, %29 : vector<16x1xi32>
    %c0_i32_10 = arith.constant 0 : i32
    %31 = vector.broadcast %c0_i32_10 : i32 to vector<16x1xi32>
    %32 = arith.cmpi ne, %6, %31 : vector<16x1xi32>
    %33 = arith.andi %30, %32 : vector<16x1xi1>
    %c0_11 = arith.constant 0 : index
    %c0_12 = arith.constant 0 : index
    %34 = vector.load %arg6[%c0_11, %c0_12] : memref<16x1xf32, #tpu.memory_space<vmem>>, vector<16x1xf32>
    %35 = arith.subf %15, %22 : vector<16x1xf32>
    %cst_13 = arith.constant 0.000000e+00 : f32
    %36 = vector.broadcast %cst_13 : f32 to vector<16x1xf32>
    %37 = arith.select %33, %35, %36 : vector<16x1xi1>, vector<16x1xf32>
    %38 = arith.addf %34, %37 : vector<16x1xf32>
    %c0_14 = arith.constant 0 : index
    %c0_15 = arith.constant 0 : index
    %39 = vector.load %arg6[%c0_14, %c0_15] : memref<16x1xf32, #tpu.memory_space<vmem>>, vector<16x1xf32>
    tpu.vector_store %arg6[%c0_14, %c0_15], %38 {strides = array<i32>} : memref<16x1xf32, #tpu.memory_space<vmem>>, vector<16x1xf32>,
    %c0_i32_16 = arith.constant 0 : i32
    %40 = arith.cmpi eq, %arg2, %c0_i32_16 : i32
    %41 = arith.extui %40 : i1 to i32
    %c0_i32_17 = arith.constant 0 : i32
    %42 = arith.cmpi ne, %41, %c0_i32_17 : i32
    scf.if %42 {
      %c0_18 = arith.constant 0 : index
      %c0_19 = arith.constant 0 : index
      %43 = vector.load %arg6[%c0_18, %c0_19] : memref<16x1xf32, #tpu.memory_space<vmem>>, vector<16x1xf32>
      %cst_20 = arith.constant dense<0.000000e+00> : vector<1xf32>
      %44 = vector.multi_reduction <add>, %43, %cst_20 [0] : vector<16x1xf32> to vector<1xf32>
      %45 = vector.shape_cast %44 : vector<1xf32> to vector<1x1xf32>
      %c0_21 = arith.constant 0 : index
      %c0_22 = arith.constant 0 : index
      %c0_23 = arith.constant 0 : index
      %46 = vector.load %arg5[%c0_21, %c0_22, %c0_23] : memref<1x1x1xf32, #tpu.memory_space<vmem>>, vector<1x1x1xf32>
      %47 = vector.shape_cast %46 : vector<1x1x1xf32> to vector<1x1xf32>
      %48 = vector.shape_cast %45 : vector<1x1xf32> to vector<1x1x1xf32>
      tpu.vector_store %arg5[%c0_21, %c0_22, %c0_23], %48 {strides = array<i32>} : memref<1x1x1xf32, #tpu.memory_space<vmem>>, vector<1x1x1xf32>,
    } else {
    }
    return
  }
  func.func @transform_0(%arg0: i32, %arg1: i32, %arg2: i32) -> (i32, i32, i32) {
    %c1_i32 = arith.constant 1 : i32
    %0 = arith.muli %arg1, %c1_i32 : i32
    %1 = arith.addi %0, %arg2 : i32
    %c0_i32 = arith.constant 0 : i32
    %2 = arith.minsi %1, %c0_i32 : i32
    %c0_i32_0 = arith.constant 0 : i32
    %c0_i32_1 = arith.constant 0 : i32
    return %arg0, %2, %c0_i32_0 : i32, i32, i32
  }
  func.func @transform_1(%arg0: i32, %arg1: i32, %arg2: i32) -> (i32, i32, i32) {
    %c1_i32 = arith.constant 1 : i32
    %0 = arith.muli %arg1, %c1_i32 : i32
    %1 = arith.addi %0, %arg2 : i32
    %c0_i32 = arith.constant 0 : i32
    %2 = arith.minsi %1, %c0_i32 : i32
    %c0_i32_0 = arith.constant 0 : i32
    %c0_i32_1 = arith.constant 0 : i32
    return %arg0, %2, %c0_i32_0 : i32, i32, i32
  }
  func.func @transform_2(%arg0: i32, %arg1: i32, %arg2: i32) -> (i32, i32, i32) {
    %c1_i32 = arith.constant 1 : i32
    %0 = arith.muli %arg0, %c1_i32 : i32
    %1 = arith.addi %0, %arg1 : i32
    %c0_i32 = arith.constant 0 : i32
    %c0_i32_0 = arith.constant 0 : i32
    %c0_i32_1 = arith.constant 0 : i32
    return %1, %c0_i32, %c0_i32_0 : i32, i32, i32
  }
}

</mosaic_0001>

<bundles_post_ra>
// kernel: tpu_custom_call.1
= control target key start
LH: loop header
LB: loop body
LE: loop exit
PB: predicated region body
PF: predicated region fallthrough
CT: control target
= control target key end

     0   :  { %v231_v2 = vmov 0   ;;  %s279_s0 = inlined_call_operand.vmem [shape: f32[1,16,128], index: 0, kind: input, shape index: {}]   ;;  %s280_s1 = inlined_call_operand.vmem [shape: s32[1,16,1], index: 1, kind: input, shape index: {}]   ;;  %s281_s2 = inlined_call_operand.hbm [shape: f32[1,1,1], index: 2, kind: output, shape index: {}]  }
   0x1   :  { %v84_v0 = vld [vmem:[%s279_s0] sm:$0xff]  ;;  %197 = vset.pattern.permute.xlu1 %v231_v2 }
   0x2   :  { %v86_v1 = vld [vmem:[%s280_s1] sm:$0xff]  ;;  %88 = vmax.xlane.f32.xlu0 %v84_v0 }
   0x3   :  { %7 = vsyncpa [#allocation4], 0  ;;  %v85_v3 = vld [vmem:[%s279_s0 + $0x8] sm:$0xff]  ;;  %111 = vperm.xlu1 %197, %v86_v1   ;;  %198 = vset.pattern.permute.xlu0 %v231_v2  ;;  %v108_v10 = vlaneseq  ;;  %vm81_vm2 = vcmask 7168   ;;  %v232_v19 = vmov 0.0   ;;  %vm134_vm3 = vcmp.ne.s32.totalorder %v86_v1, 0 }
   0x4   :  { %v87_v4 = vld [vmem:[%s280_s1 + $0x8] sm:$0xff]  ;;  %82 = vst.msk [vmem:[#allocation2] sm:$0xff] %vm81_vm2, %v232_v19  ;;  %83 = vst.msk [vmem:[#allocation2 + $0x8] sm:$0xff] %vm81_vm2, %v232_v19  ;;  %s233_s0 = smov [#allocation3]   ;;  %vm163_vm5 = vcmask 0  }
   0x5   :  { %v109_v13 = vand.u32 127, %v108_v10  ;;  %vm135_vm4 = vcmp.ne.s32.totalorder %v87_v4, 0  ;;  %s174_s1 = sshll.u32 %s233_s0, 4  ;;  %s175_s1 = int_to_ptr.vmem [resolvable:$true] %s174_s1 }
   0x6   :  { %90 = vmax.xlane.f32.xlu0 %v85_v3  ;;  %s207_s17 = scalar_lea.vmem %s175_s1, 16  ;;  %s211_s18 = scalar_lea.vmem %s175_s1, 32 }
   0x7   :  { %114 = vperm.xlu1 %197, %v87_v4   ;;  %p208_p0 = scmp.ne.s32.totalorder %s175_s1, %s207_s17  ;;  %p212_p1 = scmp.lt.s32.totalorder %s175_s1, %s175_s1 }
   0x8   :  { %p213_p2 = scmp.lt.s32.totalorder %s211_s18, %s207_s17 }
   0xa   :  { %p214_p3 = por %p213_p2, %p212_p1 }
   0xb   :  { %v138_v28 = vld [vmem:[#allocation2] sm:$0xff]  ;;  %v139_v34 = vld [vmem:[#allocation2 + $0x8] sm:$0xff] }
   0xc   :  { %p215_p4 = pnand %p214_p3, %p208_p0 }
  0x82   :  { %v112_v12 = vpop.permute.xlu1 %111 }
  0x83   :  { %vm116_vm0 = vcmp.eq.s32.totalorder %v109_v13, %v112_v12 }
  0x84   :  { %v118_v16 = vsel %vm116_vm0, %v84_v0, 0.0 }
  0x86   :  { %v115_v15 = vpop.permute.xlu1 %114 }
  0x87   :  { %vm117_vm1 = vcmp.eq.s32.totalorder %v109_v13, %v115_v15 }
  0x88   :  { %v119_v18 = vsel %vm117_vm1, %v85_v3, 0.0 }
  0x8f   :  { %v89_v5 = vpop.xlane.xlu0 %88 }
  0x90   :  { %v92_v6 = vsub.f32 %v84_v0, %v89_v5 }
  0x92   :  { %v94_v7 = vmul.f32 1.442695, %v92_v6 }
  0x93   :  { %v91_v8 = vpop.xlane.xlu0 %90 }
  0x94   :  { %199 = vpow2.f32 %v94_v7  ;;  %v93_v9 = vsub.f32 %v85_v3, %v91_v8 }
  0x96   :  { %v96_v11 = vmul.f32 1.442695, %v93_v9 }
  0x98   :  { %201 = vpow2.f32 %v96_v11 }
  0x9e   :  { %v200_v14 = vpop.eup %199 }
  0x9f   :  { %98 = vadd.xlane.f32.xlu0 %v200_v14 }
  0xa2   :  { %v202_v17 = vpop.eup %201 }
  0xa3   :  { %100 = vadd.xlane.f32.xlu1 %v202_v17  ;;  %120 = vadd.xlane.f32.xlu0 %v118_v16 }
  0xa7   :  { %122 = vadd.xlane.f32.xlu0 %v119_v18 }
 0x12c   :  { %v99_v20 = vpop.xlane.xlu0 %98 }
 0x12d   :  { %203 = vlog2.f32 %v99_v20 }
 0x130   :  { %v101_v21 = vpop.xlane.xlu1 %100  ;;  %v121_v24 = vpop.xlane.xlu0 %120 }
 0x131   :  { %205 = vlog2.f32 %v101_v21 }
 0x134   :  { %v123_v33 = vpop.xlane.xlu0 %122 }
 0x137   :  { %v204_v22 = vpop.eup %203 }
 0x138   :  { %v103_v23 = vmul.f32 0.6931472, %v204_v22 }
 0x13a   :  { %v106_v25 = vadd.f32 %v103_v23, %v89_v5 }
 0x13b   :  { %v206_v26 = vpop.eup %205 }
 0x13c   :  { %v105_v27 = vmul.f32 0.6931472, %v206_v26  ;;  %v140_v29 = vsub.f32 %v106_v25, %v121_v24 }
 0x13e   :  { %v142_v30 = vsel %vm134_vm3, %v140_v29, 0.0  ;;  %v107_v31 = vadd.f32 %v105_v27, %v91_v8 }
 0x13f   :  { %v144_v32 = vadd.f32 %v142_v30, %v138_v28 }
 0x140   :  { %v141_v35 = vsub.f32 %v107_v31, %v123_v33 }
 0x141   :  { %147 = vst.msk [vmem:[#allocation2] sm:$0xff] %vm81_vm2, %v144_v32 }
 0x142   :  { %v143_v36 = vsel %vm135_vm4, %v141_v35, 0.0 }
 0x143   :  { %v145_v37 = vadd.f32 %v143_v36, %v139_v34 }
 0x145   :  { %148 = vst.msk [vmem:[#allocation2 + $0x8] sm:$0xff] %vm81_vm2, %v145_v37 }
 0x148   :  { %v152_v38 = vld [vmem:[#allocation2] sm:$0xff] }
 0x149   :  { %v154_v40 = vsel %vm81_vm2, %v152_v38, 0.0 }
 0x14c   :  { %v153_v39 = vld [vmem:[#allocation2 + $0x8] sm:$0xff] }
 0x14d   :  { %v155_v41 = vsel %vm81_vm2, %v153_v39, 0.0 }
 0x14e   :  { %v156_v42 = vadd.f32 %v155_v41, %v154_v40 }
 0x150   :  { %v157_v43 = vrot.slane %v156_v42, 4 }
 0x152   :  { %v158_v44 = vadd.f32 %v157_v43, %v156_v42 }
 0x154   :  { %v159_v45 = vrot.slane %v158_v44, 2 }
 0x156   :  { %v160_v46 = vadd.f32 %v159_v45, %v158_v44 }
 0x158   :  { %v161_v47 = vrot.slane %v160_v46, 1 }
 0x15a   :  { %v162_v48 = vadd.f32 %v161_v47, %v160_v46 }
 0x15c   :  { %164 = vst.msk [vmem:[#allocation3] sm:$0x1] %vm163_vm5, %v162_v48 }
 0x15d   :  { %218 = shalt.err (!%p215_p4)
}
 0x15e   :  { %s219_s21 = scalar_lea.hbm %s281_s2, 16 }
 0x15f   :  { %p220_p5 = scmp.ne.s32.totalorder %s281_s2, %s219_s21  ;;  %p223_p6 = scmp.lt.u32.totalorder %s219_s21, %s281_s2 }
 0x161   :  { %p225_p7 = pnand %p223_p6, %p220_p5 }
 0x163   :  { %228 = shalt.err (!%p225_p7)
}
 0x164   :  { %177 = dma.vmem_to_hbm [thread:$0]  %s175_s1, 16, %s281_s2, [#allocation4]  }
 0x165   :  { %229 = dma.done.wait [#allocation4], 16  }
 0x166   :  { %230 = vsyncadd [#allocation4], 4294967280 }
 0x167   :  { %181 = vsyncpa [#allocation4], 1 }

</bundles_post_ra>
